<compile_context>
chip_gen: v6e
topology: v6e:2x2x1
jax: 0.10.0
libtpu: 0.0.40
codegen_flags: <defaults>
</compile_context>

<pallas_src>
import functools

import jax
import jax.numpy as jnp
from jax.experimental import pallas as pl
from jax.experimental.pallas import tpu as pltpu

HIDDEN = 512  # fixed by the PyTorch module (fc1: dim->512, fc2: 512->dim)


def _round_up(x, m):
    return (x + m - 1) // m * m


# ---------------------------------------------------------------------------
# Exact-erf GELU helpers
# ---------------------------------------------------------------------------
def _erf_poly(x):
    """float32 erf approximation (Abramowitz & Stegun 7.1.26), |error| <= ~1e-3
    with the approx reciprocal (well inside the bf16-matmul noise floor).

    Built only from ops guaranteed to lower in Mosaic (abs/mul/add/exp/where) plus
    pl.reciprocal(approx=True), which runs on the EUP slot instead of the VALU.
    """
    p = 0.3275911
    a1, a2, a3, a4, a5 = (0.254829592, -0.284496736, 1.421413741,
                          -1.453152027, 1.061405429)
    ax = jnp.abs(x)
    t = pl.reciprocal(1.0 + p * ax, approx=True)          # EUP, not VALU divide
    poly = ((((a5 * t + a4) * t + a3) * t + a2) * t + a1) * t
    y = 1.0 - poly * jnp.exp(-ax * ax)                    # exp also on EUP
    return jnp.where(x < 0.0, -y, y)


def _gelu_exact(h, native_erf):
    """GELU with exact erf (matches torch.nn.GELU() default).  f32 elementwise.
    (bf16 GELU is a further option on v6e/v7x; kept f32 for accuracy / v5e.)"""
    if native_erf:
        return 0.5 * h * (1.0 + jax.lax.erf(h * 0.7071067811865476))
    return 0.5 * h * (1.0 + _erf_poly(h * 0.7071067811865476))


@functools.lru_cache(maxsize=None)
def _native_erf_supported():
    """Probe whether lax.erf lowers+compiles inside a Pallas TPU kernel.

    Lowering + AOT compile only (no device execution, cached once per process).
    """
    def k(x_ref, o_ref):
        o_ref[...] = jax.lax.erf(x_ref[...])
    try:
        f = pl.pallas_call(k, out_shape=jax.ShapeDtypeStruct((8, 128), jnp.float32))
        jax.jit(f).lower(jax.ShapeDtypeStruct((8, 128), jnp.float32)).compile()
        return True
    except Exception:
        # Lowering/compile unavailable -> f32-accurate polynomial fallback.
        return False


# ---------------------------------------------------------------------------
# Fused MLP kernel
# ---------------------------------------------------------------------------
def _mlp_kernel(x_ref, w1_ref, b1_ref, w2_ref, b2_ref, o_ref, *, native_erf):
    """Fused fc1 -> exact-erf GELU -> fc2 for one (tm, dim) row tile.

    x_ref : (tm, dim)      row tile of tokens (batch*seq folded into rows)
    w1_ref: (dim, hidden)  fc1 weight, pre-transposed to (in, out), bf16
    b1_ref: (1, hidden)    f32
    w2_ref: (hidden, dim)  fc2 weight, pre-transposed to (in, out), bf16
    b2_ref: (1, dim)       f32
    o_ref : (tm, dim)
    """
    # bf16 MXU operands, f32 accumulation.  (dim=128: half-fills v6e/v7x MXU width.)
    x = x_ref[...].astype(jnp.bfloat16)
    h = jnp.dot(x, w1_ref[...].astype(jnp.bfloat16),
                preferred_element_type=jnp.float32)
    h = _gelu_exact(h + b1_ref[...], native_erf)          # hidden never leaves VMEM
    y = jnp.dot(h.astype(jnp.bfloat16), w2_ref[...].astype(jnp.bfloat16),
                preferred_element_type=jnp.float32) + b2_ref[...]
    o_ref[...] = y.astype(o_ref.dtype)


def mlp_forward(x, params, *, tile_m=1024):
    """Mlp forward: x of shape (..., dim) -> (..., dim), single fused pallas_call."""
    w1, b1, w2, b2 = params["w1"], params["b1"], params["w2"], params["b2"]
    dim = x.shape[-1]
    hidden = w1.shape[1]

    x2 = x.reshape(-1, dim)                               # fold batch/seq; no copy/cast
    m = x2.shape[0]
    itemsize = x2.dtype.itemsize
    align = {4: 8, 2: 16, 1: 32}.get(itemsize, 8)         # sublane alignment for x dtype

    # --- row-tile sizing from a VMEM budget -------------------------------------
    # per-row VMEM: double-buffered x tile + double-buffered out tile
    #               + ~8x f32 (row, hidden) GELU temporaries/hidden activation.
    bytes_per_row = 2 * dim * itemsize + 2 * dim * itemsize + 8 * hidden * 4
    budget = 24 * 1024 * 1024
    tm = min(tile_m, max(align, (budget // bytes_per_row) // align * align))
    # Guarantee >= 2 grid steps when m allows, so v7x's 2 TCs both get work.
    tm = max(align, min(tm, _round_up(pl.cdiv(m, 2), align)))
    grid_m = pl.cdiv(m, tm)                               # ragged last tile is masked

    weights_bytes = (w1.size * w1.dtype.itemsize + w2.size * w2.dtype.itemsize
                     + b1.size * b1.dtype.itemsize + b2.size * b2.dtype.itemsize)
    vmem_need = 2 * weights_bytes + tm * bytes_per_row
    # >= 32 MiB (raises v5e's 16 MiB scoped default), <= 64 MiB (v7x physical).
    vmem_limit = int(min(64 * 1024 * 1024, max(32 * 1024 * 1024, 2 * vmem_need)))

    cost = pl.CostEstimate(
        flops=4 * m * dim * hidden,                       # two matmuls
        transcendentals=m * hidden,                       # one erf/exp per hidden elem
        bytes_accessed=m * dim * 2 * itemsize + weights_bytes)

    kernel = functools.partial(_mlp_kernel, native_erf=_native_erf_supported())
    out = pl.pallas_call(
        kernel,
        out_shape=jax.ShapeDtypeStruct((m, dim), x.dtype),
        grid=(grid_m,),
        in_specs=[
            pl.BlockSpec((tm, dim), lambda i: (i, 0)),       # row tile
            pl.BlockSpec((dim, hidden), lambda i: (0, 0)),   # W1 (VMEM-resident)
            pl.BlockSpec((1, hidden), lambda i: (0, 0)),     # b1
            pl.BlockSpec((hidden, dim), lambda i: (0, 0)),   # W2 (VMEM-resident)
            pl.BlockSpec((1, dim), lambda i: (0, 0)),        # b2
        ],
        out_specs=pl.BlockSpec((tm, dim), lambda i: (i, 0)),
        compiler_params=pltpu.CompilerParams(
            dimension_semantics=("parallel",),               # megacore shards row tiles
            vmem_limit_bytes=vmem_limit),
        cost_estimate=cost,
    )(x2, w1, b1.reshape(1, hidden), w2, b2.reshape(1, dim))

    return out.reshape(x.shape)


# ---------------------------------------------------------------------------
# Parameters (shapes / init follow the PyTorch __init__ / _init_weights)
# ---------------------------------------------------------------------------
def init_params(key, dim, hidden=HIDDEN, weight_dtype=jnp.bfloat16):
    k1, k2, k3, k4 = jax.random.split(key, 4)

    def xavier(k, fan_in, fan_out):
        # xavier_uniform bound is symmetric in fan_in/fan_out, so we can directly
        # initialize the pre-transposed (in, out) matrix used by the kernel.
        a = (6.0 / (fan_in + fan_out)) ** 0.5
        w = jax.random.uniform(k, (fan_in, fan_out), jnp.float32, -a, a)
        return w.astype(weight_dtype)                       # bf16 MXU operands

    return dict(
        w1=xavier(k1, dim, hidden),
        b1=1e-6 * jax.random.normal(k2, (hidden,), jnp.float32),
        w2=xavier(k3, hidden, dim),
        b2=1e-6 * jax.random.normal(k4, (dim,), jnp.float32),
    )


def mlp_reference(x, params):
    """Pure-JAX f32 reference (exact-erf GELU, dropout = identity), same weights."""
    w1 = params["w1"].astype(jnp.float32)
    w2 = params["w2"].astype(jnp.float32)
    h = x.astype(jnp.float32) @ w1 + params["b1"]
    h = jax.nn.gelu(h, approximate=False)
    y = h @ w2 + params["b2"]
    return y.astype(x.dtype)


if __name__ == "__main__":
    key = jax.random.PRNGKey(0)
    kx, kp = jax.random.split(key)

    # dim multiple of 128 -> lane-dense output stores; N=9 gives m=18 rows, i.e. a
    # 2-step row grid (both v7x TCs busy) with a ragged, masked last tile.
    B, N, dim = 2, 9, 128
    x = jax.random.normal(kx, (B, N, dim), jnp.float32)
    params = init_params(kp, dim)

    fwd = jax.jit(lambda inp: mlp_forward(inp, params))
    out = jax.block_until_ready(fwd(x))

    assert out.shape == (B, N, dim), out.shape
    assert bool(jnp.all(jnp.isfinite(out)))

    ref = jax.block_until_ready(jax.jit(lambda inp: mlp_reference(inp, params))(x))
    max_err = float(jnp.max(jnp.abs(out - ref)))
    # bf16 MXU operands (x / hidden rounded to bf16) vs f32 reference: |err| stays
    # well under 2e-2 at these magnitudes (output std ~0.4).
    assert max_err < 2e-2, max_err

    print("KERNEL_OK")
</pallas_src>

<mosaic_0001>
module attributes {stable_mosaic.version = 11 : i64} {
  func.func @_mlp_kernel(%arg0: i32, %arg1: memref<16x128xf32, #tpu.memory_space<vmem>>, %arg2: memref<128x512xbf16, #tpu.memory_space<vmem>>, %arg3: memref<1x512xf32, #tpu.memory_space<vmem>>, %arg4: memref<512x128xbf16, #tpu.memory_space<vmem>>, %arg5: memref<1x128xf32, #tpu.memory_space<vmem>>, %arg6: memref<16x128xf32, #tpu.memory_space<vmem>>) attributes {dimension_semantics = [#tpu.dimension_semantics<parallel>], iteration_bounds = array<i64: 2>, scalar_prefetch = 0 : i64, scratch_operands = 0 : i64, tpu.core_type = #tpu.core_type<tc>, window_params = [{transform_indices = @transform_0, window_bounds = array<i64: 16, 128>}, {pipeline_mode = #tpu.pipeline_mode<synchronous>, transform_indices = @transform_1, window_bounds = array<i64: 128, 512>}, {pipeline_mode = #tpu.pipeline_mode<synchronous>, transform_indices = @transform_2, window_bounds = array<i64: 1, 512>}, {pipeline_mode = #tpu.pipeline_mode<synchronous>, transform_indices = @transform_3, window_bounds = array<i64: 512, 128>}, {pipeline_mode = #tpu.pipeline_mode<synchronous>, transform_indices = @transform_4, window_bounds = array<i64: 1, 128>}, {transform_indices = @transform_5, window_bounds = array<i64: 16, 128>}]} {
    %c0 = arith.constant 0 : index
    %c0_0 = arith.constant 0 : index
    %0 = vector.load %arg1[%c0, %c0_0] : memref<16x128xf32, #tpu.memory_space<vmem>>, vector<16x128xf32>
    %1 = arith.truncf %0 : vector<16x128xf32> to vector<16x128xbf16>
    %c0_1 = arith.constant 0 : index
    %c0_2 = arith.constant 0 : index
    %2 = vector.load %arg2[%c0_1, %c0_2] : memref<128x512xbf16, #tpu.memory_space<vmem>>, vector<128x512xbf16>
    %cst = arith.constant dense<0.000000e+00> : vector<16x512xf32>
    %3 = tpu.matmul %1, %2, %cst {dimension_numbers = #tpu.dot_dimension_numbers<[1], [0], [0], [1], [0, 0, 1, 1], [], []>} : vector<16x128xbf16>, vector<128x512xbf16>, vector<16x512xf32> -> vector<16x512xf32>
    %c0_3 = arith.constant 0 : index
    %c0_4 = arith.constant 0 : index
    %4 = vector.load %arg3[%c0_3, %c0_4] : memref<1x512xf32, #tpu.memory_space<vmem>>, vector<1x512xf32>
    %5 = vector.broadcast %4 : vector<1x512xf32> to vector<16x512xf32>
    %6 = arith.addf %3, %5 : vector<16x512xf32>
    %cst_5 = arith.constant 5.000000e-01 : f32
    %7 = vector.broadcast %cst_5 : f32 to vector<16x512xf32>
    %8 = arith.mulf %7, %6 : vector<16x512xf32>
    %cst_6 = arith.constant 0.707106769 : f32
    %9 = vector.broadcast %cst_6 : f32 to vector<16x512xf32>
    %10 = arith.mulf %6, %9 : vector<16x512xf32>
    %11 = math.absf %10 : vector<16x512xf32>
    %cst_7 = arith.constant 0.327591091 : f32
    %12 = vector.broadcast %cst_7 : f32 to vector<16x512xf32>
    %13 = arith.mulf %12, %11 : vector<16x512xf32>
    %cst_8 = arith.constant 1.000000e+00 : f32
    %14 = vector.broadcast %cst_8 : f32 to vector<16x512xf32>
    %15 = arith.addf %14, %13 : vector<16x512xf32>
    %16 = tpu.reciprocal %15 {approx = true} : vector<16x512xf32> -> vector<16x512xf32>
    %cst_9 = arith.constant 1.06140542 : f32
    %17 = vector.broadcast %cst_9 : f32 to vector<16x512xf32>
    %18 = arith.mulf %17, %16 : vector<16x512xf32>
    %cst_10 = arith.constant -1.45315206 : f32
    %19 = vector.broadcast %cst_10 : f32 to vector<16x512xf32>
    %20 = arith.addf %18, %19 : vector<16x512xf32>
    %21 = arith.mulf %20, %16 : vector<16x512xf32>
    %cst_11 = arith.constant 1.42141378 : f32
    %22 = vector.broadcast %cst_11 : f32 to vector<16x512xf32>
    %23 = arith.addf %21, %22 : vector<16x512xf32>
    %24 = arith.mulf %23, %16 : vector<16x512xf32>
    %cst_12 = arith.constant -0.284496725 : f32
    %25 = vector.broadcast %cst_12 : f32 to vector<16x512xf32>
    %26 = arith.addf %24, %25 : vector<16x512xf32>
    %27 = arith.mulf %26, %16 : vector<16x512xf32>
    %cst_13 = arith.constant 0.254829586 : f32
    %28 = vector.broadcast %cst_13 : f32 to vector<16x512xf32>
    %29 = arith.addf %27, %28 : vector<16x512xf32>
    %30 = arith.mulf %29, %16 : vector<16x512xf32>
    %cst_14 = arith.constant 0.000000e+00 : f32
    %31 = vector.broadcast %cst_14 : f32 to vector<16x512xf32>
    %32 = arith.subf %31, %11 : vector<16x512xf32>
    %33 = arith.mulf %32, %11 : vector<16x512xf32>
    %34 = math.exp %33 : vector<16x512xf32>
    %35 = arith.mulf %30, %34 : vector<16x512xf32>
    %cst_15 = arith.constant 1.000000e+00 : f32
    %36 = vector.broadcast %cst_15 : f32 to vector<16x512xf32>
    %37 = arith.subf %36, %35 : vector<16x512xf32>
    %cst_16 = arith.constant 0.000000e+00 : f32
    %38 = vector.broadcast %cst_16 : f32 to vector<16x512xf32>
    %39 = arith.cmpf olt, %10, %38 : vector<16x512xf32>
    %cst_17 = arith.constant 0.000000e+00 : f32
    %40 = vector.broadcast %cst_17 : f32 to vector<16x512xf32>
    %41 = arith.subf %40, %37 : vector<16x512xf32>
    %42 = arith.select %39, %41, %37 : vector<16x512xi1>, vector<16x512xf32>
    %cst_18 = arith.constant 1.000000e+00 : f32
    %43 = vector.broadcast %cst_18 : f32 to vector<16x512xf32>
    %44 = arith.addf %43, %42 : vector<16x512xf32>
    %45 = arith.mulf %8, %44 : vector<16x512xf32>
    %46 = arith.truncf %45 : vector<16x512xf32> to vector<16x512xbf16>
    %c0_19 = arith.constant 0 : index
    %c0_20 = arith.constant 0 : index
    %47 = vector.load %arg4[%c0_19, %c0_20] : memref<512x128xbf16, #tpu.memory_space<vmem>>, vector<512x128xbf16>
    %cst_21 = arith.constant dense<0.000000e+00> : vector<16x128xf32>
    %48 = tpu.matmul %46, %47, %cst_21 {dimension_numbers = #tpu.dot_dimension_numbers<[1], [0], [0], [1], [0, 0, 1, 1], [], []>} : vector<16x512xbf16>, vector<512x128xbf16>, vector<16x128xf32> -> vector<16x128xf32>
    %c0_22 = arith.constant 0 : index
    %c0_23 = arith.constant 0 : index
    %49 = vector.load %arg5[%c0_22, %c0_23] : memref<1x128xf32, #tpu.memory_space<vmem>>, vector<1x128xf32>
    %50 = vector.broadcast %49 : vector<1x128xf32> to vector<16x128xf32>
    %51 = arith.addf %48, %50 : vector<16x128xf32>
    %c0_24 = arith.constant 0 : index
    %c0_25 = arith.constant 0 : index
    %52 = vector.load %arg6[%c0_24, %c0_25] : memref<16x128xf32, #tpu.memory_space<vmem>>, vector<16x128xf32>
    tpu.vector_store %arg6[%c0_24, %c0_25], %51 {strides = array<i32>} : memref<16x128xf32, #tpu.memory_space<vmem>>, vector<16x128xf32>,
    return
  }
  func.func @transform_0(%arg0: i32) -> (i32, i32) {
    %c0_i32 = arith.constant 0 : i32
    %c0_i32_0 = arith.constant 0 : i32
    return %arg0, %c0_i32 : i32, i32
  }
  func.func @transform_1(%arg0: i32) -> (i32, i32) {
    %c0_i32 = arith.constant 0 : i32
    %c0_i32_0 = arith.constant 0 : i32
    %c0_i32_1 = arith.constant 0 : i32
    return %c0_i32, %c0_i32_0 : i32, i32
  }
  func.func @transform_2(%arg0: i32) -> (i32, i32) {
    %c0_i32 = arith.constant 0 : i32
    %c0_i32_0 = arith.constant 0 : i32
    %c0_i32_1 = arith.constant 0 : i32
    return %c0_i32, %c0_i32_0 : i32, i32
  }
  func.func @transform_3(%arg0: i32) -> (i32, i32) {
    %c0_i32 = arith.constant 0 : i32
    %c0_i32_0 = arith.constant 0 : i32
    %c0_i32_1 = arith.constant 0 : i32
    return %c0_i32, %c0_i32_0 : i32, i32
  }
  func.func @transform_4(%arg0: i32) -> (i32, i32) {
    %c0_i32 = arith.constant 0 : i32
    %c0_i32_0 = arith.constant 0 : i32
    %c0_i32_1 = arith.constant 0 : i32
    return %c0_i32, %c0_i32_0 : i32, i32
  }
  func.func @transform_5(%arg0: i32) -> (i32, i32) {
    %c0_i32 = arith.constant 0 : i32
    %c0_i32_0 = arith.constant 0 : i32
    return %arg0, %c0_i32 : i32, i32
  }
}

</mosaic_0001>

<bundles_post_ra>
// kernel: _lambda_.1
= control target key start
LH: loop header
LB: loop body
LE: loop exit
PB: predicated region body
PF: predicated region fallthrough
CT: control target
= control target key end

     0   :  { %10 = vsyncpa [#allocation3], 0  ;;  %s2189_s0 = inlined_call_operand.vmem [shape: f32[18,128], index: 0, kind: input, shape index: {}]   ;;  %s2190_s1 = inlined_call_operand.hbm [shape: bf16[128,512], index: 1, kind: input, shape index: {}]   ;;  %s2191_s2 = inlined_call_operand.vmem [shape: f32[1,512], index: 2, kind: input, shape index: {}]   ;;  %s2192_s3 = inlined_call_operand.hbm [shape: bf16[512,128], index: 3, kind: input, shape index: {}]   ;;  %s2193_s4 = inlined_call_operand.vmem [shape: f32[1,128], index: 4, kind: input, shape index: {}]   ;;  %s2194_s5 = inlined_call_operand.vmem [shape: f32[18,128], index: 5, kind: output, shape index: {}]  }
   0x1   :  { %11 = vsyncpa [#allocation5], 0  ;;  %s1932_s18 = smov 0   ;;  %s1934_s19 = smov 0  }
   0x2   :  { %s1936_s20 = smov 0  }
   0x3 LB: > { %s1945_s21 = sadd.s32 4294967295, %s1861_s20   ;;  %s1947_s22 = sadd.s32 1, %s1861_s20   ;;  %s1861_s20 = sphi %s1936_s20, %s2205_s20   ;;  %s1857_s19 = sphi %s1934_s19, %s2204_s19   ;;  %s1853_s18 = sphi %s1932_s18, %s2203_s18  }
   0x4   : > { %s131_s23 = ssub.s32 %s1861_s20, %s1947_s22  ;;  %s134_s24 = sadd.s32 1, %s1857_s19 }
   0x5   : > { %p132_p0 = scmp.eq.s32.totalorder %s131_s23, 0  ;;  %p144_p1 = scmp.ne.s32.totalorder %s1857_s19, %s1853_s18 }
   0x6   : > { %p145_p2 = scmp.eq.s32.totalorder %s1945_s21, 1  ;;  %p1382_p3 = scmp.ge.s32.totalorder %s1861_s20, 1 }
   0x7   : > { %s1955_s25 = scalar_select %p132_p0, %s1857_s19, %s134_s24  }
   0x8   : > { %p1957_p4 = por %p145_p2, %p144_p1  ;;  %p158_p5 = scmp.lt.s32.totalorder %s1861_s20, 3 }
   0x9   : > { %p2195_p6 = scmp.eq.s32.totalorder %s1945_s21, 0  ;;  %s1895_s28 = smov [#allocation2]  }
   0xa   : > { %p1962_p7 = pnand %p1382_p3, %p158_p5  ;;  %s170_s29 = sshll.u32 %s1895_s28, 4  ;;  %s171_s29 = int_to_ptr.vmem [resolvable:$true] %s170_s29 }
   0xb   : > { %s1896_s6 = smov [#allocation4]   ;;  %s1758_s8 = scalar_lea.vmem %s171_s29, 4096 }
   0xc   : > { %p1529_p8 = pneg %p1962_p7  ;;  %s186_s7 = sshll.u32 %s1896_s6, 4  ;;  %s187_s7 = int_to_ptr.vmem [resolvable:$true] %s186_s7 }
   0xd   : > { %p1759_p11 = scmp.ne.s32.totalorder %s171_s29, %s1758_s8  ;;  %p1766_p0 = scmp.lt.s32.totalorder %s171_s29, %s171_s29 }
   0xe   : > { %p1970_p9 = pnand %p2195_p6, %p1529_p8  ;;  %p1767_p1 = scmp.lt.s32.totalorder %s1758_s8, %s1758_s8 }
  0x10   : > { %p1749_p10 = pneg %p1970_p9  ;;  %p1768_p2 = por %p1767_p1, %p1766_p0 }
  0x12   : > { %p1761_p12 = pnand %p1759_p11, %p1749_p10 }
  0x14   : > { %p1762_p13 = pneg %p1761_p12 }
  0x16   : > { %p1769_p3 = pnand %p1768_p2, %p1762_p13 }
  0x18   : > { %1772 = shalt.err (!%p1769_p3)
}
  0x19   : > { %s1897_s9 = smov 256   ;;  %s1898_s10 = smov 16  }
  0x1a   : > { %1532 = dma.hbm_to_vmem [thread:$0]  (!%p1970_p9), %s2190_s1, 4096, %s171_s29, [#allocation3], %s1897_s9, %s1897_s9, %s1898_s10  }
  0x1b   : > { %s1784_s13 = scalar_lea.vmem %s187_s7, 4096  ;;  %p1792_p12 = scmp.lt.s32.totalorder %s187_s7, %s187_s7 }
  0x1c   : > { %p1785_p5 = scmp.ne.s32.totalorder %s187_s7, %s1784_s13  ;;  %p1793_p6 = scmp.lt.s32.totalorder %s1784_s13, %s1784_s13 }
  0x1e   : > { %p1787_p8 = pnand %p1785_p5, %p1749_p10  ;;  %p1794_p0 = por %p1793_p6, %p1792_p12 }
  0x20   : > { %p1788_p11 = pneg %p1787_p8 }
  0x22   : > { %p1795_p13 = pnand %p1794_p0, %p1788_p11 }
  0x24   : > { %1798 = shalt.err (!%p1795_p13)
}
  0x25   : > { %s1899_s14 = smov 64   ;;  %s1900_s15 = smov 4  }
  0x26   : > { %1535 = dma.hbm_to_vmem [thread:$0]  (!%p1970_p9), %s2192_s3, 4096, %s187_s7, [#allocation5], %s1899_s14, %s1899_s14, %s1900_s15  }
  0x27   : > { %222 = sbr.rel (%p1962_p7) target bundleno = 587 (0x24b), region = 40  ;;  %p2199_p1 = scmp.eq.s32.totalorder (!%p1962_p7), %s1945_s21, 0 }
  0x2c   : > { %1844 = dma.done.wait (%p2199_p1), [#allocation3], 4096   ;;  %p2200_p10 = pmov %p2199_p1 }
  0x2d   : > { %p2201_p6 = pmov %p2199_p1 }
  0x2e   : > { %1846 = vsyncadd (%p2200_p10), [#allocation3], 4294963200 }
  0x2f   : > { %1848 = dma.done.wait (%p2201_p6), [#allocation5], 4096   ;;  %p2202_p2 = pmov %p2199_p1 }
  0x30   : > { %v1901_v0 = vmov 0   ;;  %v1635_v1 = vld [vmem:[#allocation2 + $0xe4] ss:$16 sps:$4 sm:$0xff]   ;;  %v1637_v2 = vld [vmem:[#allocation2 + $0xec] ss:$16 sps:$4 sm:$0xff]   ;;  %s2003_s20 = sshll.u32 %s1945_s21, 1 }
  0x31   : > { %1850 = vsyncadd (%p2202_p2), [#allocation5], 4294963200  ;;  %526 = vmatprep.mubr.bf16.mxu0 %v1901_v0  ;;  %569 = vmatprep.mubr.bf16.mxu1 %v1901_v0  ;;  %v1639_v3 = vld [vmem:[#allocation2 + $0xe0] ss:$16 sps:$4 sm:$0xff]   ;;  %v1640_v4 = vld [vmem:[#allocation2 + $0xe8] ss:$16 sps:$4 sm:$0xff]  }
  0x32   : > { %494 = vmatprep.subr.bf16.mxu0 %v1635_v1  ;;  %537 = vmatprep.subr.bf16.mxu1 %v1637_v2  ;;  %v1641_v5 = vld [vmem:[#allocation2 + $0xc4] ss:$16 sps:$4 sm:$0xff]   ;;  %v1643_v6 = vld [vmem:[#allocation2 + $0xcc] ss:$16 sps:$4 sm:$0xff]   ;;  %v1645_v7 = vld [vmem:[#allocation2 + $0xc0] ss:$16 sps:$4 sm:$0xff]  }
  0x33   : > { %495 = vmatpush1.bf16.msra.mxu0 %v1639_v3  ;;  %538 = vmatpush1.bf16.msra.mxu1 %v1640_v4  ;;  %v1646_v8 = vld [vmem:[#allocation2 + $0xc8] ss:$16 sps:$4 sm:$0xff]   ;;  %v1647_v9 = vld [vmem:[#allocation2 + $0xa4] ss:$16 sps:$4 sm:$0xff]   ;;  %v1649_v10 = vld [vmem:[#allocation2 + $0xac] ss:$16 sps:$4 sm:$0xff]   ;;  %v314_v4 = vlaneseq }
  0x34   : > { %496 = vmatprep.subr.bf16.mxu0 %v1641_v5  ;;  %539 = vmatprep.subr.bf16.mxu1 %v1643_v6  ;;  %v1651_v11 = vld [vmem:[#allocation2 + $0xa0] ss:$16 sps:$4 sm:$0xff]   ;;  %v1652_v12 = vld [vmem:[#allocation2 + $0xa8] ss:$16 sps:$4 sm:$0xff]   ;;  %v1653_v13 = vld [vmem:[#allocation2 + $0x84] ss:$16 sps:$4 sm:$0xff]  }
  0x35   : > { %v1655_v14 = vld [vmem:[#allocation2 + $0x8c] ss:$16 sps:$4 sm:$0xff]   ;;  %v1657_v15 = vld [vmem:[#allocation2 + $0x80] ss:$16 sps:$4 sm:$0xff]   ;;  %v1658_v16 = vld [vmem:[#allocation2 + $0x88] ss:$16 sps:$4 sm:$0xff]  }
  0x36   : > { %v1659_v17 = vld [vmem:[#allocation2 + $0x64] ss:$16 sps:$4 sm:$0xff]   ;;  %p262_p7 = scmp.lt.s32.totalorder %s2003_s20, 2  ;;  %v1661_v18 = vld [vmem:[#allocation2 + $0x6c] ss:$16 sps:$4 sm:$0xff]   ;;  %v315_v5 = vshrl.u32 %v314_v4, 7 }
  0x37   : > { %497 = vmatpush1.bf16.msra.mxu0 %v1645_v7  ;;  %540 = vmatpush1.bf16.msra.mxu1 %v1646_v8  ;;  %v1663_v19 = vld [vmem:[#allocation2 + $0x60] ss:$16 sps:$4 sm:$0xff]   ;;  %v1664_v20 = vld [vmem:[#allocation2 + $0x68] ss:$16 sps:$4 sm:$0xff]   ;;  %v1665_v21 = vld [vmem:[#allocation2 + $0x44] ss:$16 sps:$4 sm:$0xff]  }
  0x38   : > { %498 = vmatprep.subr.bf16.mxu0 %v1647_v9  ;;  %541 = vmatprep.subr.bf16.mxu1 %v1649_v10  ;;  %s263_s23 = scalar_select %p262_p7, %s2003_s20, 2  ;;  %v1667_v22 = vld [vmem:[#allocation2 + $0x4c] ss:$16 sps:$4 sm:$0xff]   ;;  %v1669_v23 = vld [vmem:[#allocation2 + $0x40] ss:$16 sps:$4 sm:$0xff]   ;;  %v316_v6 = vsub.s32 0, %v315_v5 }
  0x39   : > { %v1670_v24 = vld [vmem:[#allocation2 + $0x48] ss:$16 sps:$4 sm:$0xff]   ;;  %v1671_v25 = vld [vmem:[#allocation2 + $0x24] ss:$16 sps:$4 sm:$0xff]   ;;  %v1673_v26 = vld [vmem:[#allocation2 + $0x2c] ss:$16 sps:$4 sm:$0xff]  }
  0x3a   : > { %s1391_s24 = sshll.u32 %s263_s23, 3  ;;  %v1675_v27 = vld [vmem:[#allocation2 + $0x20] ss:$16 sps:$4 sm:$0xff]   ;;  %v1676_v28 = vld [vmem:[#allocation2 + $0x28] ss:$16 sps:$4 sm:$0xff]   ;;  %v324_v7 = vsub.s32 2, %v315_v5 }
  0x3b   : > { %499 = vmatpush1.bf16.msra.mxu0 %v1651_v11  ;;  %542 = vmatpush1.bf16.msra.mxu1 %v1652_v12  ;;  %v1677_v29 = vld [vmem:[#allocation2 + $0x4] ss:$16 sps:$4 sm:$0xff]   ;;  %v1679_v30 = vld [vmem:[#allocation2 + $0xc] ss:$16 sps:$4 sm:$0xff]   ;;  %s265_s29 = scalar_lea.vmem %s2189_s0, %s1391_s24  ;;  %v1681_v31 = vld [vmem:[#allocation2] ss:$16 sps:$4 sm:$0xff]  }
  0x3c   : > { %500 = vmatprep.subr.bf16.mxu0 %v1653_v13  ;;  %543 = vmatprep.subr.bf16.mxu1 %v1655_v14  ;;  %v1682_v32 = vld [vmem:[#allocation2 + $0x8] ss:$16 sps:$4 sm:$0xff]   ;;  %v277_v33 = vld [vmem:[%s265_s29] sm:$0xff]  ;;  %v1687_v40 = vld [vmem:[#allocation4 + $0x70] sm:$0xff]   ;;  %v320_v9 = vsub.s32 1, %v315_v5  ;;  %v328_v10 = vsub.s32 3, %v315_v5 }
  0x3d   : > { %v278_v34 = vld [vmem:[%s265_s29 + $0x8] sm:$0xff]  ;;  %v1683_v36 = vld [vmem:[#allocation4 + $0x78] sm:$0xff]   ;;  %v1688_v41 = vld [vmem:[#allocation4 + $0xf0] sm:$0xff]   ;;  %s254_s9 = sand.u32 1, %s1853_s18   ;;  %s1147_s18 = ssub.s32 (%p1957_p4), 3, %s2003_s20 }
  0x3e   : > { %v279_v35 = vpack.c.bf16 %v278_v34, %v277_v33  ;;  %v1684_v37 = vld [vmem:[#allocation4 + $0xf8] sm:$0xff]   ;;  %v1689_v42 = vld [vmem:[#allocation4 + $0x30] sm:$0xff]   ;;  %v1691_v44 = vld [vmem:[#allocation4 + $0x68] sm:$0xff]   ;;  %s1389_s10 = sshll.u32 %s254_s9, 4  ;;  %s1474_s12 = sshll.u32 (%p1957_p4), %s1945_s21, 4 }
  0x3f   : > { %501 = vmatpush1.bf16.msra.mxu0 %v1657_v15  ;;  %544 = vmatpush1.bf16.msra.mxu1 %v1658_v16  ;;  %v1685_v38 = vld [vmem:[#allocation4 + $0x38] sm:$0xff]   ;;  %v1690_v43 = vld [vmem:[#allocation4 + $0xb0] sm:$0xff]   ;;  %v1692_v45 = vld [vmem:[#allocation4 + $0xe8] sm:$0xff]   ;;  %s2144_s11 = scalar_lea.vmem [#allocation6], %s1389_s10   ;;  %p1148_p9 = scmp.lt.s32.totalorder (%p1957_p4), %s1147_s18, 2 }
  0x40   : > { %502 = vmatprep.subr.bf16.mxu0 %v1659_v17  ;;  %545 = vmatprep.subr.bf16.mxu1 %v1661_v18  ;;  %v1686_v39 = vld [vmem:[#allocation4 + $0xb8] sm:$0xff]   ;;  %v1693_v46 = vld [vmem:[#allocation4 + $0x28] sm:$0xff]   ;;  %v1695_v48 = vld [vmem:[#allocation4 + $0x60] sm:$0xff]   ;;  %s2155_s15 = scalar_lea.vmem (%p1957_p4), %s2194_s5, %s1474_s12  }
  0x41   : > { %v1694_v47 = vld [vmem:[#allocation4 + $0xa8] sm:$0xff]   ;;  %v1696_v49 = vld [vmem:[#allocation4 + $0xe0] sm:$0xff]   ;;  %v1699_v52 = vld [vmem:[#allocation4 + $0x58] sm:$0xff]  }
  0x42   : > { %v1697_v50 = vld [vmem:[#allocation4 + $0x20] sm:$0xff]   ;;  %v1700_v53 = vld [vmem:[#allocation4 + $0xd8] sm:$0xff]   ;;  %v1703_v56 = vld [vmem:[#allocation4 + $0x50] sm:$0xff]  }
  0x43   : > { %503 = vmatpush1.bf16.msra.mxu0 %v1663_v19  ;;  %546 = vmatpush1.bf16.msra.mxu1 %v1664_v20  ;;  %v1698_v51 = vld [vmem:[#allocation4 + $0xa0] sm:$0xff]   ;;  %v1701_v54 = vld [vmem:[#allocation4 + $0x18] sm:$0xff]   ;;  %v1704_v57 = vld [vmem:[#allocation4 + $0xd0] sm:$0xff]  }
  0x44   : > { %504 = vmatprep.subr.bf16.mxu0 %v1665_v21  ;;  %547 = vmatprep.subr.bf16.mxu1 %v1667_v22  ;;  %v1702_v55 = vld [vmem:[#allocation4 + $0x98] sm:$0xff]   ;;  %v1705_v58 = vld [vmem:[#allocation4 + $0x10] sm:$0xff]   ;;  %v1707_v60 = vld [vmem:[#allocation4 + $0x48] sm:$0xff]  }
  0x45   : > { %v1706_v59 = vld [vmem:[#allocation4 + $0x90] sm:$0xff]   ;;  %v1708_v61 = vld [vmem:[#allocation4 + $0xc8] sm:$0xff]   ;;  %v1711_v0 = vld [vmem:[#allocation4 + $0x40] sm:$0xff]  }
  0x46   : > { %v1709_v62 = vld [vmem:[#allocation4 + $0x8] sm:$0xff]   ;;  %v1712_v1 = vld [vmem:[#allocation4 + $0xc0] sm:$0xff]  }
  0x47   : > { %505 = vmatpush1.bf16.msra.mxu0 %v1669_v23  ;;  %548 = vmatpush1.bf16.msra.mxu1 %v1670_v24  ;;  %v1710_v63 = vld [vmem:[#allocation4 + $0x88] sm:$0xff]   ;;  %v1713_v2 = vld [vmem:[#allocation4] sm:$0xff]  }
  0x48   : > { %506 = vmatprep.subr.bf16.mxu0 %v1671_v25  ;;  %549 = vmatprep.subr.bf16.mxu1 %v1673_v26  ;;  %v1714_v3 = vld [vmem:[#allocation4 + $0x80] sm:$0xff]  }
  0x49   : > { %v312_v8 = vld [vmem:[%s2191_s2] sm:$0xf] }
  0x4a   : > { %v317_v11 = vrot.slane %v312_v8, %v316_v6  ;;  %v325_v12 = vrot.slane %v312_v8, %v324_v7  ;;  %v321_v15 = vrot.slane %v312_v8, %v320_v9  ;;  %v329_v16 = vrot.slane %v312_v8, %v328_v10 }
  0x4b   : > { %507 = vmatpush1.bf16.msra.mxu0 %v1675_v27  ;;  %550 = vmatpush1.bf16.msra.mxu1 %v1676_v28 }
  0x4c   : > { %508 = vmatprep.subr.bf16.mxu0 %v1677_v29  ;;  %551 = vmatprep.subr.bf16.mxu1 %v1679_v30 }
  0x4f   : > { %509 = vmatpush1.bf16.msra.mxu0 %v1681_v31  ;;  %552 = vmatpush1.bf16.msra.mxu1 %v1682_v32 }
  0x50   : > { %1477 = vmatprep.subr.bf16.mxu0 %v1683_v36  ;;  %1499 = vmatprep.subr.bf16.mxu1 %v1684_v37 }
  0x52   : > { %527 = vmatmul.mubr.bf16.vlgmr.msra.gmra.mxu0 %v279_v35  ;;  %570 = vmatmul.mubr.bf16.vlgmr.msra.gmra.mxu1 %v279_v35 }
  0x53   : > { %1478 = vmatpush3.bf16.msra.mxu0 %v1685_v38  ;;  %1500 = vmatpush3.bf16.msra.mxu1 %v1686_v39 }
  0x54   : > { %1479 = vmatprep.subr.bf16.mxu0 %v1687_v40  ;;  %1501 = vmatprep.subr.bf16.mxu1 %v1688_v41 }
  0x57   : > { %1480 = vmatpush3.bf16.msra.mxu0 %v1689_v42  ;;  %1502 = vmatpush3.bf16.msra.mxu1 %v1690_v43 }
  0x58   : > { %1481 = vmatprep.subr.bf16.mxu0 %v1691_v44  ;;  %1503 = vmatprep.subr.bf16.mxu1 %v1692_v45 }
  0x5b   : > { %1482 = vmatpush3.bf16.msra.mxu0 %v1693_v46  ;;  %1504 = vmatpush3.bf16.msra.mxu1 %v1694_v47 }
  0x5c   : > { %1483 = vmatprep.subr.bf16.mxu0 %v1695_v48  ;;  %1505 = vmatprep.subr.bf16.mxu1 %v1696_v49 }
  0x5f   : > { %1484 = vmatpush3.bf16.msra.mxu0 %v1697_v50  ;;  %1506 = vmatpush3.bf16.msra.mxu1 %v1698_v51 }
  0x60   : > { %1485 = vmatprep.subr.bf16.mxu0 %v1699_v52  ;;  %1507 = vmatprep.subr.bf16.mxu1 %v1700_v53 }
  0x63   : > { %1486 = vmatpush3.bf16.msra.mxu0 %v1701_v54  ;;  %1508 = vmatpush3.bf16.msra.mxu1 %v1702_v55 }
  0x64   : > { %1487 = vmatprep.subr.bf16.mxu0 %v1703_v56  ;;  %1509 = vmatprep.subr.bf16.mxu1 %v1704_v57 }
  0x67   : > { %1488 = vmatpush3.bf16.msra.mxu0 %v1705_v58  ;;  %1510 = vmatpush3.bf16.msra.mxu1 %v1706_v59 }
  0x68   : > { %1489 = vmatprep.subr.bf16.mxu0 %v1707_v60  ;;  %1511 = vmatprep.subr.bf16.mxu1 %v1708_v61 }
  0x6b   : > { %1490 = vmatpush3.bf16.msra.mxu0 %v1709_v62  ;;  %1512 = vmatpush3.bf16.msra.mxu1 %v1710_v63 }
  0x6c   : > { %1491 = vmatprep.subr.bf16.mxu0 %v1711_v0  ;;  %1513 = vmatprep.subr.bf16.mxu1 %v1712_v1 }
  0x6f   : > { %1492 = vmatpush3.bf16.msra.mxu0 %v1713_v2  ;;  %1514 = vmatpush3.bf16.msra.mxu1 %v1714_v3 }
 0x112   : > { %v528_v13 = vpop.f32.mrf.mxu0  ;;  %v571_v14 = vpop.f32.mrf.mxu1 }
 0x113   : > { %v2013_v17 = vadd.f32 %v528_v13, %v317_v11  ;;  %v2015_v18 = vadd.f32 %v571_v14, %v325_v12 }
 0x114   : > { %v530_v19 = vpop.f32.mrf.mxu0  ;;  %v573_v20 = vpop.f32.mrf.mxu1 }
 0x115   : > { %v2018_v21 = vmul.f32 0.70710677, %v2013_v17  ;;  %v2021_v22 = vmul.f32 0.70710677, %v2015_v18  ;;  %v2023_v23 = vadd.f32 %v530_v19, %v321_v15  ;;  %v2025_v24 = vadd.f32 %v573_v20, %v329_v16 }
 0x116   : > { %v532_v31 = vpop.f32.mrf.mxu0  ;;  %v575_v39 = vpop.f32.mrf.mxu1 }
 0x117   : > { %v596_v25 = vand.u32 2147483647, %v2018_v21  ;;  %v598_v26 = vand.u32 2147483647, %v2021_v22  ;;  %v2030_v27 = vmul.f32 0.70710677, %v2023_v23  ;;  %v2037_v38 = vadd.f32 %v532_v31, %v317_v11 }
 0x118   : > { %v2033_v28 = vmul.f32 0.70710677, %v2025_v24  ;;  %v534_v40 = vpop.f32.mrf.mxu0  ;;  %v2042_v44 = vadd.f32 %v575_v39, %v325_v12  ;;  %v577_v47 = vpop.f32.mrf.mxu1  ;;  %vm748_vm1 = vcmp.lt.f32.partialorder %v2018_v21, 0.0  ;;  %vm750_vm3 = vcmp.lt.f32.partialorder %v2021_v22, 0.0 }
 0x119   : > { %v604_v29 = vmul.f32 0.3275911, %v596_v25  ;;  %v606_v30 = vmul.f32 0.3275911, %v598_v26  ;;  %v597_v32 = vand.u32 2147483647, %v2030_v27  ;;  %v2044_v45 = vadd.f32 %v534_v40, %v321_v15 }
 0x11a   : > { %v599_v33 = vand.u32 2147483647, %v2033_v28  ;;  %v2040_v43 = vmul.f32 0.70710677, %v2037_v38  ;;  %v2048_v48 = vmul.f32 0.70710677, %v2042_v44  ;;  %v2054_v52 = vadd.f32 %v577_v47, %v329_v16 }
 0x11b   : > { %v612_v34 = vadd.f32 1.0, %v604_v29  ;;  %v614_v35 = vadd.f32 1.0, %v606_v30  ;;  %v605_v36 = vmul.f32 0.3275911, %v597_v32  ;;  %v2051_v50 = vmul.f32 0.70710677, %v2044_v45 }
 0x11c   : > { %v607_v37 = vmul.f32 0.3275911, %v599_v33  ;;  %v600_v46 = vand.u32 2147483647, %v2040_v43  ;;  %v602_v51 = vand.u32 2147483647, %v2048_v48 }
 0x11d   : > { %1715 = vrcp.f32 %v612_v34  ;;  %v613_v41 = vadd.f32 1.0, %v605_v36  ;;  %v700_v53 = vsub.f32 0.0, %v596_v25  ;;  %v601_v55 = vand.u32 2147483647, %v2051_v50 }
 0x11e   : > { %1717 = vrcp.f32 %v614_v35  ;;  %v615_v42 = vadd.f32 1.0, %v607_v37  ;;  %v608_v49 = vmul.f32 0.3275911, %v600_v46  ;;  %v610_v56 = vmul.f32 0.3275911, %v602_v51 }
 0x11f   : > { %1719 = vrcp.f32 %v613_v41  ;;  %v2058_v57 = vmul.f32 0.70710677, %v2054_v52  ;;  %v702_v58 = vsub.f32 0.0, %v598_v26  ;;  %v609_v59 = vmul.f32 0.3275911, %v601_v55 }
 0x120   : > { %1721 = vrcp.f32 %v615_v42  ;;  %v616_v54 = vadd.f32 1.0, %v608_v49  ;;  %v701_v60 = vsub.f32 0.0, %v597_v32  ;;  %v618_v61 = vadd.f32 1.0, %v610_v56 }
 0x121   : > { %v2061_v62 = vand.u32 2147483647, %v2058_v57  ;;  %v708_v63 = vmul.f32 %v700_v53, %v596_v25  ;;  %v617_v0 = vadd.f32 1.0, %v609_v59  ;;  %v703_v2 = vsub.f32 0.0, %v599_v33 }
 0x122   : > { %1723 = vrcp.f32 %v616_v54  ;;  %v710_v6 = vmul.f32 %v702_v58, %v598_v26  ;;  %v709_v8 = vmul.f32 %v701_v60, %v597_v32  ;;  %v704_v9 = vsub.f32 0.0, %v600_v46 }
 0x123   : > { %1725 = vrcp.f32 %v618_v61  ;;  %v611_v3 = vmul.f32 0.3275911, %v2061_v62  ;;  %v716_v12 = vmul.f32 1.442695, %v708_v63  ;;  %v711_v15 = vmul.f32 %v703_v2, %v599_v33 }
 0x124   : > { %1727 = vrcp.f32 %v617_v0  ;;  %v706_v16 = vsub.f32 0.0, %v602_v51  ;;  %v720_v20 = vmul.f32 1.442695, %v710_v6  ;;  %v718_v30 = vmul.f32 1.442695, %v709_v8 }
 0x125   : > { %v619_v10 = vadd.f32 1.0, %v611_v3  ;;  %v712_v31 = vmul.f32 %v704_v9, %v600_v46  ;;  %v705_v32 = vsub.f32 0.0, %v601_v55  ;;  %v722_v37 = vmul.f32 1.442695, %v711_v15 }
 0x126   : > { %v714_v39 = vmul.f32 %v706_v16, %v602_v51  ;;  %v707_v60 = vsub.f32 0.0, %v2061_v62  ;;  %vm752_vm0 = vcmp.lt.f32.partialorder %v2040_v43, 0.0  ;;  %vm749_vm2 = vcmp.lt.f32.partialorder %v2030_v27, 0.0 }
 0x127   : > { %1729 = vrcp.f32 %v619_v10  ;;  %v724_v46 = vmul.f32 1.442695, %v712_v31  ;;  %v713_v53 = vmul.f32 %v705_v32, %v601_v55  ;;  %vm751_vm4 = vcmp.lt.f32.partialorder %v2033_v28, 0.0 }
 0x128   : > { %1731 = vpow2.f32 %v716_v12  ;;  %v728_v51 = vmul.f32 1.442695, %v714_v39  ;;  %vm754_vm5 = vcmp.lt.f32.partialorder %v2048_v48, 0.0  ;;  %vm753_vm6 = vcmp.lt.f32.partialorder %v2051_v50, 0.0 }
 0x129   : > { %1733 = vpow2.f32 %v720_v20  ;;  %v726_v10 = vmul.f32 1.442695, %v713_v53  ;;  %v580_v28 = vmul.f32 0.5, %v2013_v17  ;;  %vm755_vm7 = vcmp.lt.f32.partialorder %v2058_v57, 0.0 }
 0x12a   : > { %v2063_v1 = vpop.eup %1715  ;;  %1735 = vpow2.f32 %v718_v30  ;;  %v587_v22 = vmul.f32 0.5, %v2054_v52 }
 0x12b   : > { %v2066_v4 = vpop.eup %1717  ;;  %v628_v5 = vmul.f32 1.0614054, %v2063_v1  ;;  %1737 = vpow2.f32 %v722_v37 }
 0x12c   : > { %v630_v7 = vmul.f32 1.0614054, %v2066_v4  ;;  %v2070_v13 = vpop.eup %1719  ;;  %1739 = vpow2.f32 %v724_v46 }
 0x12d   : > { %v636_v11 = vadd.f32 -1.4531521, %v628_v5  ;;  %v629_v25 = vmul.f32 1.0614054, %v2070_v13  ;;  %v2074_v26 = vpop.eup %1721  ;;  %1741 = vpow2.f32 %v728_v51 }
 0x12e   : > { %v638_v14 = vadd.f32 -1.4531521, %v630_v7  ;;  %v631_v36 = vmul.f32 1.0614054, %v2074_v26  ;;  %1743 = vpow2.f32 %v726_v10 }
 0x12f   : > { %v644_v19 = vmul.f32 %v2063_v1, %v636_v11  ;;  %v637_v35 = vadd.f32 -1.4531521, %v629_v25  ;;  %v2080_v47 = vpop.eup %1723 }
 0x130   : > { %v646_v29 = vmul.f32 %v2066_v4, %v638_v14  ;;  %v639_v42 = vadd.f32 -1.4531521, %v631_v36  ;;  %v632_v59 = vmul.f32 1.0614054, %v2080_v47  ;;  %v2086_v61 = vpop.eup %1725  ;;  %v715_v14 = vmul.f32 %v707_v60, %v2061_v62 }
 0x131   : > { %v652_v34 = vadd.f32 1.4214138, %v644_v19  ;;  %v645_v41 = vmul.f32 %v2070_v13, %v637_v35  ;;  %v2090_v5 = vpop.eup %1727  ;;  %v634_v6 = vmul.f32 1.0614054, %v2086_v61 }
 0x132   : > { %v654_v33 = vadd.f32 1.4214138, %v646_v29  ;;  %v647_v58 = vmul.f32 %v2074_v26, %v639_v42  ;;  %v640_v3 = vadd.f32 -1.4531521, %v632_v59  ;;  %v633_v12 = vmul.f32 1.0614054, %v2090_v5 }
 0x133   : > { %v660_v40 = vmul.f32 %v2063_v1, %v652_v34  ;;  %v653_v56 = vadd.f32 1.4214138, %v645_v41  ;;  %v642_v11 = vadd.f32 -1.4531521, %v634_v6  ;;  %v730_v39 = vmul.f32 1.442695, %v715_v14 }
 0x134   : > { %v662_v49 = vmul.f32 %v2066_v4, %v654_v33  ;;  %v655_v2 = vadd.f32 1.4214138, %v647_v58  ;;  %v648_v9 = vmul.f32 %v2080_v47, %v640_v3  ;;  %v2097_v15 = vpop.eup %1729  ;;  %v641_v31 = vadd.f32 -1.4531521, %v633_v12 }
 0x135   : > { %v668_v54 = vadd.f32 -0.28449672, %v660_v40  ;;  %v661_v0 = vmul.f32 %v2070_v13, %v653_v56  ;;  %v650_v30 = vmul.f32 %v2086_v61, %v642_v11  ;;  %v635_v32 = vmul.f32 1.0614054, %v2097_v15  ;;  %v1732_v40 = vpop.eup %1731 }
 0x136   : > { %v670_v55 = vadd.f32 -0.28449672, %v662_v49  ;;  %v663_v8 = vmul.f32 %v2074_v26, %v655_v2  ;;  %v656_v25 = vadd.f32 1.4214138, %v648_v9  ;;  %v649_v33 = vmul.f32 %v2090_v5, %v641_v31  ;;  %v1734_v53 = vpop.eup %1733 }
 0x137   : > { %v676_v63 = vmul.f32 %v2063_v1, %v668_v54  ;;  %v669_v7 = vadd.f32 -0.28449672, %v661_v0  ;;  %v658_v62 = vadd.f32 1.4214138, %v650_v30  ;;  %v643_v37 = vadd.f32 -1.4531521, %v635_v32  ;;  %v1736_v51 = vpop.eup %1735 }
 0x138   : > { %v671_v20 = vadd.f32 -0.28449672, %v663_v8  ;;  %v678_v29 = vmul.f32 %v2066_v4, %v670_v55  ;;  %v664_v36 = vmul.f32 %v2080_v47, %v656_v25  ;;  %v657_v58 = vadd.f32 1.4214138, %v649_v33 }
 0x139   : > { %v684_v16 = vadd.f32 0.2548296, %v676_v63  ;;  %v677_v19 = vmul.f32 %v2070_v13, %v669_v7  ;;  %v666_v56 = vmul.f32 %v2086_v61, %v658_v62  ;;  %v651_v59 = vmul.f32 %v2097_v15, %v643_v37 }
 0x13a   : > { %v679_v35 = vmul.f32 %v2074_v26, %v671_v20  ;;  %v672_v46 = vadd.f32 -0.28449672, %v664_v36  ;;  %v686_v54 = vadd.f32 0.2548296, %v678_v29  ;;  %v665_v2 = vmul.f32 %v2090_v5, %v657_v58 }
 0x13b   : > { %v685_v34 = vadd.f32 0.2548296, %v677_v19  ;;  %v692_v41 = vmul.f32 %v2063_v1, %v684_v16  ;;  %v674_v0 = vadd.f32 -0.28449672, %v666_v56  ;;  %v659_v3 = vadd.f32 1.4214138, %v651_v59  ;;  %v1738_v1 = vpop.eup %1737 }
 0x13c   : > { %v687_v49 = vadd.f32 0.2548296, %v679_v35  ;;  %v680_v60 = vmul.f32 %v2080_v47, %v672_v46  ;;  %1745 = vpow2.f32 %v730_v39  ;;  %v694_v7 = vmul.f32 %v2066_v4, %v686_v54  ;;  %v1740_v10 = vpop.eup %1739 }
 0x13d   : > { %v693_v42 = vmul.f32 %v2070_v13, %v685_v34  ;;  %v732_v55 = vmul.f32 %v1732_v40, %v692_v41  ;;  %v682_v8 = vmul.f32 %v2086_v61, %v674_v0  ;;  %v673_v9 = vadd.f32 -0.28449672, %v665_v2  ;;  %v1742_v20 = vpop.eup %1741 }
 0x13e   : > { %v695_v13 = vmul.f32 %v2074_v26, %v687_v49  ;;  %v688_v6 = vadd.f32 0.2548296, %v680_v60  ;;  %v667_v19 = vmul.f32 %v2097_v15, %v659_v3  ;;  %v734_v30 = vmul.f32 %v1734_v53, %v694_v7  ;;  %v1744_v35 = vpop.eup %1743 }
 0x13f   : > { %v733_v63 = vmul.f32 %v1736_v51, %v693_v42  ;;  %v690_v14 = vadd.f32 0.2548296, %v682_v8  ;;  %v681_v16 = vmul.f32 %v2090_v5, %v673_v9  ;;  %v740_v25 = vsub.f32 1.0, %v732_v55 }
 0x140   : > { %v696_v11 = vmul.f32 %v2080_v47, %v688_v6  ;;  %v735_v29 = vmul.f32 %v1738_v1, %v695_v13  ;;  %v675_v32 = vadd.f32 -0.28449672, %v667_v19  ;;  %v742_v41 = vsub.f32 1.0, %v734_v30 }
 0x141   : > { %v741_v12 = vsub.f32 1.0, %v733_v63  ;;  %v698_v31 = vmul.f32 %v2086_v61, %v690_v14  ;;  %v689_v4 = vadd.f32 0.2548296, %v681_v16  ;;  %v756_v33 = vsub.f32 0.0, %v740_v25 }
 0x142   : > { %v736_v26 = vmul.f32 %v1740_v10, %v696_v11  ;;  %v743_v37 = vsub.f32 1.0, %v735_v29  ;;  %v683_v40 = vmul.f32 %v2097_v15, %v675_v32  ;;  %v581_v58 = vmul.f32 0.5, %v2023_v23 }
 0x143   : > { %v757_v36 = vsub.f32 0.0, %v741_v12  ;;  %v738_v62 = vmul.f32 %v1742_v20, %v698_v31  ;;  %v697_v47 = vmul.f32 %v2090_v5, %v689_v4  ;;  %v764_v56 = vsel %vm748_vm1, %v756_v33, %v740_v25 }
 0x144   : > { %v744_v34 = vsub.f32 1.0, %v736_v26  ;;  %v691_v46 = vadd.f32 0.2548296, %v683_v40  ;;  %v759_v59 = vsub.f32 0.0, %v743_v37  ;;  %v758_v60 = vsub.f32 0.0, %v742_v41 }
 0x145   : > { %v746_v42 = vsub.f32 1.0, %v738_v62  ;;  %v737_v49 = vmul.f32 %v1744_v35, %v697_v47  ;;  %v765_v53 = vsel %vm749_vm2, %v757_v36, %v741_v12  ;;  %v772_v2 = vadd.f32 1.0, %v764_v56 }
 0x146   : > { %v760_v39 = vsub.f32 0.0, %v744_v34  ;;  %v699_v51 = vmul.f32 %v2097_v15, %v691_v46  ;;  %v773_v27 = vadd.f32 1.0, %v765_v53  ;;  %v584_v3 = vmul.f32 0.5, %v2037_v38 }
 0x147   : > { %v762_v5 = vsub.f32 0.0, %v746_v42  ;;  %v745_v54 = vsub.f32 1.0, %v737_v49  ;;  %v767_v55 = vsel %vm751_vm4, %v759_v59, %v743_v37  ;;  %v585_v15 = vmul.f32 0.5, %v2044_v45 }
 0x148   : > { %v768_v61 = vsel %vm752_vm0, %v760_v39, %v744_v34  ;;  %v766_v7 = vsel %vm750_vm3, %v758_v60, %v742_v41  ;;  %v781_v48 = vmul.f32 %v773_v27, %v581_v58  ;;  %v780_v11 = vmul.f32 %v772_v2, %v580_v28 }
 0x149   : > { %v1746_v43 = vpop.eup %1745  ;;  %v776_v21 = vadd.f32 1.0, %v768_v61  ;;  %v761_v63 = vsub.f32 0.0, %v745_v54  ;;  %v770_v1 = vsel %vm754_vm5, %v762_v5, %v746_v42  ;;  %v775_v12 = vadd.f32 1.0, %v767_v55 }
 0x14a   : > { %v739_v0 = vmul.f32 %v1746_v43, %v699_v51  ;;  %v778_v9 = vadd.f32 1.0, %v770_v1  ;;  %v774_v38 = vadd.f32 1.0, %v766_v7  ;;  %v586_v14 = vmul.f32 0.5, %v2042_v44 }
 0x14b   : > { %v769_v23 = vsel %vm753_vm6, %v761_v63, %v745_v54  ;;  %v784_v8 = vmul.f32 %v776_v21, %v584_v3  ;;  %v583_v19 = vmul.f32 0.5, %v2025_v24  ;;  %v582_v25 = vmul.f32 0.5, %v2015_v18  ;;  %v1424_v24 = vld [vmem:[%s2193_s4] ss:$0 sm:$0xff] }
 0x14c   : > { %v777_v13 = vadd.f32 1.0, %v769_v23  ;;  %v747_v6 = vsub.f32 1.0, %v739_v0  ;;  %v786_v29 = vmul.f32 %v778_v9, %v586_v14 }
 0x14d   : > { %v788_v17 = vpack.c.bf16 %v784_v8, %v780_v11  ;;  %v783_v26 = vmul.f32 %v775_v12, %v583_v19  ;;  %v782_v57 = vmul.f32 %v774_v38, %v582_v25 }
 0x14e   : > { %v785_v50 = vmul.f32 %v777_v13, %v585_v15  ;;  %v763_v10 = vsub.f32 0.0, %v747_v6 }
 0x14f   : > { %v790_v4 = vpack.c.bf16 %v786_v29, %v782_v57 }
 0x150   : > { %v771_v45 = vsel %vm755_vm7, %v763_v10, %v747_v6  ;;  %v789_v16 = vpack.c.bf16 %v785_v50, %v781_v48 }
 0x151   : > { %v779_v20 = vadd.f32 1.0, %v771_v45 }
 0x152   : > { %1087 = vmatprep.mubr.bf16.mxu0 %v789_v16 }
 0x153   : > { %v787_v30 = vmul.f32 %v779_v20, %v587_v22  ;;  %1088 = vmatmul.mubr.bf16.vlgmr.msra.gmra.mxu0 %v788_v17 }
 0x155   : > { %v791_v31 = vpack.c.bf16 %v787_v30, %v783_v26 }
 0x157   : > { %1128 = vmatprep.mubr.bf16.mxu1 %v791_v31 }
 0x158   : > { %1129 = vmatmul.mubr.bf16.vlgmr.msra.gmra.mxu1 %v790_v4 }
 0x213   : > { %v1493_v44 = vpop.f32.mrf.mxu0 }
 0x215   : > { %v1494_v32 = vpop.f32.mrf.mxu0 }
 0x216   : > { %v1495_v52 = vadd.f32 %v1494_v32, %v1493_v44 }
 0x217   : > { %v1496_v34 = vpop.f32.mrf.mxu0 }
 0x218   : > { %v1515_v18 = vpop.f32.mrf.mxu1  ;;  %v1090_v35 = vadd.f32 %v1495_v52, %v1424_v24 }
 0x219   : > { %v1497_v36 = vpop.f32.mrf.mxu0 }
 0x21a   : > { %v1516_v62 = vpop.f32.mrf.mxu1  ;;  %v1498_v47 = vadd.f32 %v1497_v36, %v1496_v34 }
 0x21b   : > { %v1517_v33 = vadd.f32 %v1516_v62, %v1515_v18 }
 0x21c   : > { %v1518_v37 = vpop.f32.mrf.mxu1  ;;  %v1093_v40 = vadd.f32 %v1498_v47, %v1424_v24 }
 0x21d   : > { %v1131_v39 = vadd.f32 %v1517_v33, %v1090_v35 }
 0x21e   : > { %v1519_v41 = vpop.f32.mrf.mxu1 }
 0x21f   : > { %1137 = vst [vmem:[%s2144_s11] sm:$0xff] %v1131_v39  ;;  %v1520_v42 = vadd.f32 %v1519_v41, %v1518_v37  ;;  %1145 = sbr.rel (!%p1957_p4) target bundleno = 587 (0x24b), region = 52 }
 0x221   : > { %v1134_v49 = vadd.f32 %v1520_v42, %v1093_v40 }
 0x223   : > { %1138 = vst [vmem:[%s2144_s11 + $0x8] sm:$0xff] %v1134_v49 }
 0x224   : > { %s2207_s18 = smov (!%p1148_p9, %s1147_s18), 2 }
 0x225   : > { %s1459_s16 = sshll.u32 %s2207_s18, 7 }
 0x226   : > { %p1462_p3 = scmp.eq.s32.totalorder %s1459_s16, 0 }
 0x227   : > { %s2161_s17 = sshrl.u32 (!%p1462_p3), %s2207_s18, 1 }
 0x228   : > { %1156 = sbr.rel (%p1462_p3) target bundleno = 587 (0x24b), region = 56  ;;  %p1463_p4 = scmp.le.s32.totalorder (!%p1462_p3), %s2161_s17, 0 }
 0x22d   : > { %1319 = sbr.rel (%p1463_p4) target bundleno = 570 (0x23a), region = 133  ;;  %s1863_s21 = smov (!%p1463_p4), %s2155_s15  }
 0x22e   : > { %s1867_s26 = smov (!%p1463_p4), %s2144_s11   ;;  %s1871_s20 = smov (!%p1463_p4), 0  }
 0x22f   : > { %s1875_s23 = smov (!%p1463_p4), 0  }
 0x232 LB: >> { %v1221_v61 = vld [vmem:[%s1869_s26] sm:$0xff]  ;;  %v1223_v46 = vld [vmem:[%s1869_s26 + $0x8] sm:$0xff]  ;;  %s1225_s24 = sadd.s32 1, %s1873_s20  ;;  %s1215_s23 = sadd.s32 1, %s1877_s23   ;;  %s1877_s23 = sphi %s1875_s23, %s1215_s23   ;;  %s1873_s20 = sphi %s1871_s20, %s1872_s20   ;;  %s1869_s26 = sphi %s1867_s26, %s1230_s26   ;;  %s1865_s21 = sphi %s1863_s21, %s1231_s21  }
 0x233   : >> { %1222 = vst [vmem:[%s1865_s21] sm:$0xff] %v1221_v61  ;;  %1224 = vst [vmem:[%s1865_s21 + $0x8] sm:$0xff] %v1223_v46  ;;  %p1226_p5 = scmp.ge.s32.totalorder %s1225_s24, %s2161_s17  ;;  %p1214_p8 = scmp.ge.s32.totalorder %s1215_s23, %s2161_s17 }
 0x235   : >> { %s2209_s24 = smov (%p1226_p5, %s1225_s24), 0  ;;  %1217 = sbr.rel (!%p1214_p8) target bundleno = 562 (0x232), region = 139 }
 0x236   : >> { %s1464_s27 = sshll.u32 %s2209_s24, 4  ;;  %s1872_s20 = smov %s2209_s24  }
 0x237   : >> { %s1230_s26 = scalar_lea.vmem %s2144_s11, %s1464_s27 [#allocation6]   ;;  %s1231_s21 = scalar_lea.vmem %s2155_s15, %s1464_s27  }
 0x23a PF: > { %s2171_s28 = sand.u32 1, %s2207_s18   ;;  %s1475_s29 = sshll.u32 %s2161_s17, 4 }
 0x23b   : > { %s1236_s30 = scalar_lea.vmem %s2144_s11, %s1475_s29 [#allocation6]   ;;  %s1238_s6 = scalar_lea.vmem %s2155_s15, %s1475_s29  }
 0x23c   : > { %p1469_p11 = scmp.le.s32.totalorder %s2171_s28, 0 }
 0x23d   : > { %s1879_s7 = smov (!%p1469_p11), %s1238_s6   ;;  %s1883_s8 = smov (!%p1469_p11), %s1236_s30  }
 0x23e   : > { %1333 = sbr.rel (%p1469_p11) target bundleno = 587 (0x24b), region = 144  ;;  %s1887_s9 = smov (!%p1469_p11), 0  }
 0x23f   : > { %s1891_s10 = smov (!%p1469_p11), 0  }
 0x243 LB: >> { %v1248_v53 = vld [vmem:[%s1885_s8] sm:$0xff]  ;;  %s1250_s18 = sadd.s32 1, %s1889_s9  ;;  %s1242_s10 = sadd.s32 1, %s1893_s10   ;;  %s1893_s10 = sphi %s1891_s10, %s1242_s10   ;;  %s1889_s9 = sphi %s1887_s9, %s1888_s9   ;;  %s1885_s8 = sphi %s1883_s8, %s1255_s8   ;;  %s1881_s7 = sphi %s1879_s7, %s1256_s7  }
 0x244   : >> { %1249 = vst [vmem:[%s1881_s7] sm:$0xff] %v1248_v53  ;;  %p1251_p12 = scmp.ge.s32.totalorder %s1250_s18, %s2171_s28  ;;  %p1241_p0 = scmp.ge.s32.totalorder %s1242_s10, %s2171_s28 }
 0x246   : >> { %s2211_s18 = smov (%p1251_p12, %s1250_s18), 0  ;;  %1244 = sbr.rel (!%p1241_p0) target bundleno = 579 (0x243), region = 150 }
 0x247   : >> { %s1470_s11 = sshll.u32 %s2211_s18, 3  ;;  %s1888_s9 = smov %s2211_s18  }
 0x248   : >> { %s1255_s8 = scalar_lea.vmem %s1236_s30, %s1470_s11 [#allocation6]   ;;  %s1256_s7 = scalar_lea.vmem %s1238_s6, %s1470_s11  }
 0x24b PF: > { %p14_p13 = scmp.ge.s32.totalorder %s1947_s22, 4   ;;  %s2203_s18 = smov %s1857_s19 }
 0x24c   : > { %s2204_s19 = smov %s1955_s25  ;;  %s2205_s20 = smov %s1947_s22 }
 0x24d   :  { %16 = sbr.rel (!%p14_p13) target bundleno = 3 (0x3), region = 161 }
 0x252   :  { %1272 = vsyncpa [#allocation3], 1 }
 0x253   :  { %1274 = vsyncpa [#allocation3 + $0x1], 1 }
 0x254   :  { %1275 = vsyncpa [#allocation5], 1 }

</bundles_post_ra>
